<compile_context>
chip_gen: v7x
topology: tpu7x:2x2x1
jax: 0.10.0
libtpu: 0.0.40
codegen_flags: <defaults>
</compile_context>

<pallas_src>
import functools

import jax
import jax.numpy as jnp
from jax.experimental import pallas as pl
from jax.experimental.pallas import tpu as pltpu

_EPS = 1e-5


def _withbias_ln_kernel(x_ref, w_ref, b_ref, o_ref):
    # x_ref: (1, C, T) — C on sublanes, spatial on lanes.
    x = x_ref[...].astype(jnp.float32)
    inv_c = 1.0 / x.shape[1]
    s1 = jnp.sum(x, axis=1, keepdims=True)           # (1, 1, T)
    s2 = jnp.sum(x * x, axis=1, keepdims=True)       # (1, 1, T)
    mu = s1 * inv_c
    var = s2 * inv_c - mu * mu                       # population variance
    inv = jax.lax.rsqrt(var + _EPS)
    w = w_ref[...].astype(jnp.float32)               # (1, C, 1)
    b = b_ref[...].astype(jnp.float32)               # (1, C, 1)
    o_ref[...] = ((x - mu) * inv * w + b).astype(o_ref.dtype)


def _biasfree_ln_kernel(x_ref, w_ref, o_ref):
    # BiasFree: var uses the mean, but x itself is NOT mean-centered.
    x = x_ref[...].astype(jnp.float32)
    inv_c = 1.0 / x.shape[1]
    s1 = jnp.sum(x, axis=1, keepdims=True)
    s2 = jnp.sum(x * x, axis=1, keepdims=True)
    mu = s1 * inv_c
    var = s2 * inv_c - mu * mu
    inv = jax.lax.rsqrt(var + _EPS)
    w = w_ref[...].astype(jnp.float32)
    o_ref[...] = (x * inv * w).astype(o_ref.dtype)


def _pick_tile_hw(hw, c, itemsize, target_bytes=2 * 1024 * 1024):
    """Largest lane tile (multiple of 128) with a (C, tile) buffer <= ~2 MiB."""
    c_eff = max(int(c), 8)                            # sublane padding
    t = target_bytes // (c_eff * max(int(itemsize), 1))
    t = max(128, (t // 128) * 128)
    if hw <= t:
        return int(hw)                                # full extent — always legal
    return int(t)


@functools.partial(jax.jit, static_argnames=("ln_type", "tile_hw"))
def layernorm_nchw(x, weight, bias, ln_type="WithBias", tile_hw=None):
    """Equivalent of LayerNorm(dim, ln_type).forward(x) for NCHW x."""
    b, c, h, w = x.shape
    hw = h * w
    x3 = x.reshape(b, c, hw)                          # contiguous: metadata-only

    if tile_hw is None:
        tile_hw = _pick_tile_hw(hw, c, jnp.dtype(x.dtype).itemsize)
    grid = (b, pl.cdiv(hw, tile_hw))                  # partial last block is masked

    x_spec = pl.BlockSpec((1, c, tile_hw), lambda i, j: (i, 0, j))
    o_spec = pl.BlockSpec((1, c, tile_hw), lambda i, j: (i, 0, j))
    p_spec = pl.BlockSpec((1, c, 1), lambda i, j: (0, 0, 0))

    params = pltpu.CompilerParams(
        dimension_semantics=("parallel", "parallel"))

    w3 = weight.reshape(1, c, 1)
    if ln_type == "BiasFree":
        out = pl.pallas_call(
            _biasfree_ln_kernel,
            out_shape=jax.ShapeDtypeStruct((b, c, hw), x.dtype),
            grid=grid,
            in_specs=[x_spec, p_spec],
            out_specs=o_spec,
            compiler_params=params,
        )(x3, w3)
    else:
        b3 = bias.reshape(1, c, 1)
        out = pl.pallas_call(
            _withbias_ln_kernel,
            out_shape=jax.ShapeDtypeStruct((b, c, hw), x.dtype),
            grid=grid,
            in_specs=[x_spec, p_spec, p_spec],
            out_specs=o_spec,
            compiler_params=params,
        )(x3, w3, b3)

    return out.reshape(b, c, h, w)


def _reference_nchw(x, weight, bias, ln_type):
    # Normalization over channels (== last axis after to_3d), in f32.
    xf = x.astype(jnp.float32)
    mu = jnp.mean(xf, axis=1, keepdims=True)
    var = jnp.mean((xf - mu) ** 2, axis=1, keepdims=True)
    wb = weight.reshape(1, -1, 1, 1).astype(jnp.float32)
    if ln_type == "BiasFree":
        y = xf / jnp.sqrt(var + _EPS) * wb
    else:
        bb = bias.reshape(1, -1, 1, 1).astype(jnp.float32)
        y = (xf - mu) / jnp.sqrt(var + _EPS) * wb + bb
    return y.astype(x.dtype)


if __name__ == "__main__":
    key = jax.random.PRNGKey(0)
    kx, kw, kb = jax.random.split(key, 3)
    B, C, H, W = 2, 4, 16, 16
    x = jax.random.normal(kx, (B, C, H, W), dtype=jnp.float32)

    # Module init is ones/zeros; perturb slightly so the affine broadcast is
    # actually exercised by the correctness check.
    weight = jnp.ones((C,), jnp.float32) + 0.1 * jax.random.normal(kw, (C,), jnp.float32)
    bias = 0.1 * jax.random.normal(kb, (C,), jnp.float32)

    ok = True
    for ln_type in ("WithBias", "BiasFree"):
        for tile in (None, 128):   # default single-tile row and a 2-step spatial grid
            out = layernorm_nchw(x, weight, bias, ln_type=ln_type, tile_hw=tile)
            out = jax.block_until_ready(out)
            ref = _reference_nchw(x, weight, bias, ln_type)
            if out.shape != (B, C, H, W):
                ok = False
            if not jnp.allclose(out, ref, atol=1e-4, rtol=1e-4):
                ok = False

    if ok:
        print("KERNEL_OK")
</pallas_src>

<mosaic_0001>
module attributes {stable_mosaic.version = 11 : i64} {
  func.func @_withbias_ln_kernel(%arg0: i32, %arg1: i32, %arg2: memref<1x4x256xf32, #tpu.memory_space<vmem>>, %arg3: memref<1x4x1xf32, #tpu.memory_space<vmem>>, %arg4: memref<1x4x1xf32, #tpu.memory_space<vmem>>, %arg5: memref<1x4x256xf32, #tpu.memory_space<vmem>>) attributes {dimension_semantics = [#tpu.dimension_semantics<parallel>, #tpu.dimension_semantics<parallel>], iteration_bounds = array<i64: 2, 1>, scalar_prefetch = 0 : i64, scratch_operands = 0 : i64, tpu.core_type = #tpu.core_type<tc>, window_params = [{transform_indices = @transform_0, window_bounds = array<i64: 1, 4, 256>}, {pipeline_mode = #tpu.pipeline_mode<synchronous>, transform_indices = @transform_1, window_bounds = array<i64: 1, 4, 1>}, {pipeline_mode = #tpu.pipeline_mode<synchronous>, transform_indices = @transform_2, window_bounds = array<i64: 1, 4, 1>}, {transform_indices = @transform_3, window_bounds = array<i64: 1, 4, 256>}]} {
    %c0 = arith.constant 0 : index
    %c0_0 = arith.constant 0 : index
    %c0_1 = arith.constant 0 : index
    %0 = vector.load %arg2[%c0, %c0_0, %c0_1] : memref<1x4x256xf32, #tpu.memory_space<vmem>>, vector<1x4x256xf32>
    %cst = arith.constant dense<0.000000e+00> : vector<1x256xf32>
    %1 = vector.multi_reduction <add>, %0, %cst [1] : vector<1x4x256xf32> to vector<1x256xf32>
    %2 = vector.shape_cast %1 : vector<1x256xf32> to vector<1x1x256xf32>
    %3 = arith.mulf %0, %0 : vector<1x4x256xf32>
    %cst_2 = arith.constant dense<0.000000e+00> : vector<1x256xf32>
    %4 = vector.multi_reduction <add>, %3, %cst_2 [1] : vector<1x4x256xf32> to vector<1x256xf32>
    %5 = vector.shape_cast %4 : vector<1x256xf32> to vector<1x1x256xf32>
    %cst_3 = arith.constant 2.500000e-01 : f32
    %6 = vector.broadcast %cst_3 : f32 to vector<1x1x256xf32>
    %7 = arith.mulf %2, %6 : vector<1x1x256xf32>
    %cst_4 = arith.constant 2.500000e-01 : f32
    %8 = vector.broadcast %cst_4 : f32 to vector<1x1x256xf32>
    %9 = arith.mulf %5, %8 : vector<1x1x256xf32>
    %10 = arith.mulf %7, %7 : vector<1x1x256xf32>
    %11 = arith.subf %9, %10 : vector<1x1x256xf32>
    %cst_5 = arith.constant 9.99999974E-6 : f32
    %12 = vector.broadcast %cst_5 : f32 to vector<1x1x256xf32>
    %13 = arith.addf %11, %12 : vector<1x1x256xf32>
    %14 = math.rsqrt %13 : vector<1x1x256xf32>
    %c0_6 = arith.constant 0 : index
    %c0_7 = arith.constant 0 : index
    %c0_8 = arith.constant 0 : index
    %15 = vector.load %arg3[%c0_6, %c0_7, %c0_8] : memref<1x4x1xf32, #tpu.memory_space<vmem>>, vector<1x4x1xf32>
    %c0_9 = arith.constant 0 : index
    %c0_10 = arith.constant 0 : index
    %c0_11 = arith.constant 0 : index
    %16 = vector.load %arg4[%c0_9, %c0_10, %c0_11] : memref<1x4x1xf32, #tpu.memory_space<vmem>>, vector<1x4x1xf32>
    %17 = vector.broadcast %7 : vector<1x1x256xf32> to vector<1x4x256xf32>
    %18 = arith.subf %0, %17 : vector<1x4x256xf32>
    %19 = vector.broadcast %14 : vector<1x1x256xf32> to vector<1x4x256xf32>
    %20 = arith.mulf %18, %19 : vector<1x4x256xf32>
    %21 = vector.broadcast %15 : vector<1x4x1xf32> to vector<1x4x256xf32>
    %22 = arith.mulf %20, %21 : vector<1x4x256xf32>
    %23 = vector.broadcast %16 : vector<1x4x1xf32> to vector<1x4x256xf32>
    %24 = arith.addf %22, %23 : vector<1x4x256xf32>
    %c0_12 = arith.constant 0 : index
    %c0_13 = arith.constant 0 : index
    %c0_14 = arith.constant 0 : index
    %25 = vector.load %arg5[%c0_12, %c0_13, %c0_14] : memref<1x4x256xf32, #tpu.memory_space<vmem>>, vector<1x4x256xf32>
    tpu.vector_store %arg5[%c0_12, %c0_13, %c0_14], %24 {strides = array<i32>} : memref<1x4x256xf32, #tpu.memory_space<vmem>>, vector<1x4x256xf32>,
    return
  }
  func.func @transform_0(%arg0: i32, %arg1: i32) -> (i32, i32, i32) {
    %c0_i32 = arith.constant 0 : i32
    %c0_i32_0 = arith.constant 0 : i32
    return %arg0, %c0_i32, %arg1 : i32, i32, i32
  }
  func.func @transform_1(%arg0: i32, %arg1: i32) -> (i32, i32, i32) {
    %c0_i32 = arith.constant 0 : i32
    %c0_i32_0 = arith.constant 0 : i32
    %c0_i32_1 = arith.constant 0 : i32
    %c0_i32_2 = arith.constant 0 : i32
    return %c0_i32, %c0_i32_0, %c0_i32_1 : i32, i32, i32
  }
  func.func @transform_2(%arg0: i32, %arg1: i32) -> (i32, i32, i32) {
    %c0_i32 = arith.constant 0 : i32
    %c0_i32_0 = arith.constant 0 : i32
    %c0_i32_1 = arith.constant 0 : i32
    %c0_i32_2 = arith.constant 0 : i32
    return %c0_i32, %c0_i32_0, %c0_i32_1 : i32, i32, i32
  }
  func.func @transform_3(%arg0: i32, %arg1: i32) -> (i32, i32, i32) {
    %c0_i32 = arith.constant 0 : i32
    %c0_i32_0 = arith.constant 0 : i32
    return %arg0, %c0_i32, %arg1 : i32, i32, i32
  }
}

</mosaic_0001>

<bundles_post_ra>
// kernel: layernorm_nchw.1
= control target key start
LH: loop header
LB: loop body
LE: loop exit
PB: predicated region body
PF: predicated region fallthrough
CT: control target
= control target key end

     0   :  { %s476_s12 = smov 0   ;;  %s478_s13 = smov 0   ;;  %s522_s0 = inlined_call_operand.vmem [shape: f32[2,4,256], index: 0, kind: input, shape index: {}]   ;;  %s523_s1 = inlined_call_operand.vmem [shape: f32[1,4,1], index: 1, kind: input, shape index: {}]   ;;  %s524_s2 = inlined_call_operand.vmem [shape: f32[1,4,1], index: 2, kind: input, shape index: {}]   ;;  %s525_s3 = inlined_call_operand.vmem [shape: f32[2,4,256], index: 3, kind: output, shape index: {}]  }
   0x1   :  { %s480_s14 = smov 0  }
   0x2 LB: > { %s25_s15 = sadd.s32 1, %s448_s13  ;;  %p389_p0 = scmp.ge.s32.totalorder %s452_s14, 1  ;;  %s452_s14 = sphi %s480_s14, %s13_s14   ;;  %s448_s13 = sphi %s478_s13, %s527_s13   ;;  %s444_s12 = sphi %s476_s12, %s526_s12  }
   0x3   : > { %p27_p1 = scmp.ge.s32.totalorder %s25_s15, 2  ;;  %p158_p2 = scmp.lt.s32.totalorder %s452_s14, 3 }
   0x5   : > { %s529_s15 = smov (%p27_p1, %s25_s15), 0  ;;  %p159_p3 = pnand %p389_p0, %p158_p2 }
   0x6   : > { %v259_v0 = vld [vmem:[%s523_s1] sm:$0xf] (!%p159_p3)  ;;  %v454_v1 = vmov (!%p159_p3), 0   ;;  %p191_p4 = scmp.lt.s32.totalorder (!%p159_p3), %s444_s12, 1  ;;  %vm214_vm0 = vcmask (!%p159_p3), 1043456   ;;  %v278_v47 = vlaneseq (!%p159_p3) }
   0x7   : > { %162 = sbr.rel (%p159_p3) target bundleno = 145 (0x91), region = 32  ;;  %424 = vset.pattern.permute.xlu0 (!%p159_p3), %v454_v1  ;;  %v260_v2 = vld [vmem:[%s524_s2] sm:$0xf] (!%p159_p3)  ;;  %v455_v45 = vmov (!%p159_p3), 839922192  }
   0x8   : > { %273 = vperm.xlu0 (!%p159_p3), %424, %v259_v0   ;;  %v276_v46 = vunpack.c.l.s4 (!%p159_p3), %v455_v45  ;;  %v279_v50 = vshrl.u32 (!%p159_p3), %v278_v47, 7 }
   0xa   : > { %v277_v49 = vunpack.c.0.s8 (!%p159_p3), %v276_v46 }
   0xc   : > { %286 = vperm.xlu0 (!%p159_p3), %424, %v260_v2   ;;  %v280_v53 = vsub.s32 (!%p159_p3), %v277_v49, %v279_v50 }
   0xe   : > { %s531_s12 = smov (!%p191_p4, %s444_s12), 1 }
   0xf   : > { %s396_s20 = sshll.u32 %s531_s12, 3 }
  0x10   : > { %s198_s23 = scalar_lea.vmem %s522_s0, %s396_s20  ;;  %s208_s26 = scalar_lea.vmem %s525_s3, %s396_s20 }
  0x11   : > { %v210_v3 = vld [vmem:[%s198_s23] sm:$0xff] }
  0x12   : > { %v212_v4 = vcombine.high %v210_v3, %v210_v3  ;;  %v229_v5 = vmul.f32 %v210_v3, %v210_v3  ;;  %v215_v6 = vsel %vm214_vm0, %v210_v3, 0.0 }
  0x13   : > { %v216_v9 = vrot.slane %v215_v6, 4 }
  0x14   : > { %v222_v7 = vsel %vm214_vm0, %v212_v4, 0.0  ;;  %v231_v8 = vcombine.high %v229_v5, %v229_v5  ;;  %v233_v11 = vsel %vm214_vm0, %v229_v5, 0.0 }
  0x15   : > { %v223_v10 = vrot.slane %v222_v7, 4  ;;  %v217_v13 = vadd.f32 %v216_v9, %v215_v6  ;;  %v234_v14 = vrot.slane %v233_v11, 4 }
  0x16   : > { %v240_v12 = vsel %vm214_vm0, %v231_v8, 0.0 }
  0x17   : > { %v224_v15 = vadd.f32 %v223_v10, %v222_v7  ;;  %v241_v16 = vrot.slane %v240_v12, 4  ;;  %v218_v17 = vrot.slane %v217_v13, 2  ;;  %v235_v18 = vadd.f32 %v234_v14, %v233_v11 }
  0x19   : > { %v225_v19 = vrot.slane %v224_v15, 2  ;;  %v242_v20 = vadd.f32 %v241_v16, %v240_v12  ;;  %v219_v21 = vadd.f32 %v218_v17, %v217_v13  ;;  %v236_v22 = vrot.slane %v235_v18, 2 }
  0x1b   : > { %v226_v23 = vadd.f32 %v225_v19, %v224_v15  ;;  %v243_v24 = vrot.slane %v242_v20, 2  ;;  %v220_v25 = vrot.slane %v219_v21, 1  ;;  %v237_v26 = vadd.f32 %v236_v22, %v235_v18 }
  0x1d   : > { %v227_v27 = vrot.slane %v226_v23, 1  ;;  %v244_v28 = vadd.f32 %v243_v24, %v242_v20  ;;  %v221_v29 = vadd.f32 %v220_v25, %v219_v21  ;;  %v238_v30 = vrot.slane %v237_v26, 1 }
  0x1f   : > { %v228_v31 = vadd.f32 %v227_v27, %v226_v23  ;;  %v245_v32 = vrot.slane %v244_v28, 1  ;;  %v239_v33 = vadd.f32 %v238_v30, %v237_v26  ;;  %v247_v34 = vmul.f32 0.25, %v221_v29 }
  0x21   : > { %v246_v35 = vadd.f32 %v245_v32, %v244_v28  ;;  %v248_v36 = vmul.f32 0.25, %v228_v31  ;;  %v249_v37 = vmul.f32 0.25, %v239_v33  ;;  %v251_v38 = vmul.f32 %v247_v34, %v247_v34 }
  0x23   : > { %v250_v39 = vmul.f32 0.25, %v246_v35  ;;  %v252_v40 = vmul.f32 %v248_v36, %v248_v36  ;;  %v253_v41 = vsub.f32 %v249_v37, %v251_v38  ;;  %v263_v51 = vcombine.low %v247_v34, %v248_v36 }
  0x25   : > { %v254_v42 = vsub.f32 %v250_v39, %v252_v40  ;;  %v255_v43 = vadd.f32 1e-05, %v253_v41  ;;  %v265_v54 = vsub.f32 %v210_v3, %v263_v51 }
  0x27   : > { %v256_v44 = vadd.f32 1e-05, %v254_v42  ;;  %426 = vrsqrt.f32 %v255_v43 }
  0x29   : > { %428 = vrsqrt.f32 %v256_v44 }
  0x31   : > { %v427_v48 = vpop.eup %426 }
  0x33   : > { %v429_v52 = vpop.eup %428 }
  0x34   : > { %v268_v55 = vcombine.low %v427_v48, %v429_v52 }
  0x36   : > { %v270_v57 = vmul.f32 %v268_v55, %v265_v54 }
  0x87   : > { %v274_v56 = vpop.permute.xlu0 %273 }
  0x88   : > { %v281_v58 = vrot.slane %v274_v56, %v280_v53 }
  0x8a   : > { %v283_v60 = vmul.f32 %v281_v58, %v270_v57 }
  0x8b   : > { %v287_v59 = vpop.permute.xlu0 %286 }
  0x8c   : > { %v294_v61 = vrot.slane %v287_v59, %v280_v53 }
  0x8e   : > { %v296_v62 = vadd.f32 %v294_v61, %v283_v60 }
  0x90   : > { %297 = vst [vmem:[%s208_s26] sm:$0xff] %v296_v62 }
  0x91 PF: > { %s13_s14 = sadd.s32 1, %s452_s14   ;;  %s526_s12 = smov %s448_s13 }
  0x92   : > { %p10_p5 = scmp.ge.s32.totalorder %s13_s14, 4   ;;  %s527_s13 = smov %s529_s15 }
  0x94   :  { %12 = sbr.rel (!%p10_p5) target bundleno = 2 (0x2), region = 62 }

</bundles_post_ra>
